<compile_context>
chip_gen: v7x
topology: tpu7x:2x2x1
jax: 0.10.0
libtpu: 0.0.40
codegen_flags: <defaults>
</compile_context>

<pallas_src>
import functools
import math

import jax
import jax.numpy as jnp
from jax.experimental import pallas as pl
from jax.experimental.pallas import tpu as pltpu


def _bf16_exp_default():
    """bf16 EUP exp is a win on v6e/v7x only; be conservative if unsure."""
    try:
        kind = jax.devices()[0].device_kind.lower()
    except Exception:
        return False
    return any(tag in kind for tag in ("v6", "v7", "7x"))


def casamento_kernel(row_ref, col_ref, zc_ref, wc_ref, zr_ref, wr_ref, out_ref,
                     *, npairs, ppc, use_bf16_exp):
    """One grid step = one (tile x tile) block pair of the symmetric pairwise matrix.

    row_ref/col_ref: scalar-prefetched (SMEM) block indices of the pair list.
    out_ref: resident (8, tile) f32 accumulator block for this core.
    """
    c = pl.program_id(0)          # core / partial-output index ("parallel")
    p = pl.program_id(1)          # position in this core's pair list ("arbitrary")

    @pl.when(p == 0)
    def _():
        out_ref[...] = jnp.zeros_like(out_ref)

    flat = c * ppc + p
    r_blk = row_ref[flat]
    c_blk = col_ref[flat]
    # 1x for diagonal blocks, 2x for strictly-upper blocks (symmetry),
    # 0x for padded entries of the pair list.
    mult = jnp.where(flat < npairs,
                     jnp.where(r_blk == c_blk, 1.0, 2.0),
                     0.0).astype(jnp.float32)

    zc = zc_ref[...]              # (tile, 1) column slice of pre-scaled z
    wc = wc_ref[...]              # (tile, 1) column slice of w
    zr = zr_ref[...]              # (1, tile) row slice of pre-scaled z
    wr = wr_ref[...]              # (1, tile) row slice of w

    diff = zc - zr                              # (tile, tile) outer difference
    arg = -(diff * diff)                        # constants already folded into z
    if use_bf16_exp:
        g = jnp.exp(arg.astype(jnp.bfloat16)).astype(jnp.float32)  # EUP bf16 path
    else:
        g = jnp.exp(arg)                        # EUP f32 path
    wg = wc * g                                 # row-weighted Gaussian block

    # Sublane-partial reduction to (8, tile): layout-preserving reshape + vector
    # adds; no per-step cross-lane XLU reduce, no serialized scalar accumulator.
    t = out_ref.shape[1]
    part = jnp.sum(wg.reshape(t // 8, 8, t), axis=0)        # (8, tile)
    out_ref[...] += (mult * wr) * part


def casamento_loss(d, y, sig=1.0, *, use_bf16_exp=None, tile=None):
    """d: (N,), y: (M,) -> scalar loss matching CasamentoLoss.forward(d, y)."""
    d = jnp.asarray(d, jnp.float32).reshape(-1)
    y = jnp.asarray(y, jnp.float32).reshape(-1)
    n = d.shape[0]
    m = y.shape[0]
    if n == 0 or m == 0:
        raise ValueError("CasamentoLoss requires non-empty d and y")
    if use_bf16_exp is None:
        use_bf16_exp = _bf16_exp_default()

    inv_scale = 1.0 / (sig * math.sqrt(2.0))          # folds 1/sig and the 0.5
    coef = 1.0 / (sig * math.sqrt(2.0 * math.pi))

    # Combined vector (pre-scaled) + signed weights: +1/M for y, -1/N for d.
    z = jnp.concatenate([y, d]) * jnp.float32(inv_scale)
    w = jnp.concatenate([jnp.full((m,), 1.0 / m, jnp.float32),
                         jnp.full((n,), -1.0 / n, jnp.float32)])

    L = n + m
    # Tile selection: cap at 512 so per-step (tile, tile) f32 temporaries stay
    # ~1 MiB — fits comfortably in v5e's 16 MiB scoped default and v7x's VMEM.
    if tile is None:
        if L <= 512:
            tile = max(128, ((L + 127) // 128) * 128)     # single block pair
        elif L <= 4096:
            tile = 256
        else:
            tile = 512
    Lp = ((L + tile - 1) // tile) * tile
    z = jnp.pad(z, (0, Lp - L))                   # pad value irrelevant:
    w = jnp.pad(w, (0, Lp - L))                   # weight 0 kills padded pairs

    zc = z.reshape(Lp, 1)
    wc = w.reshape(Lp, 1)
    zr = z.reshape(1, Lp)
    wr = w.reshape(1, Lp)

    # Enumerate only upper-triangular block pairs (j >= i): ~2x fewer exps.
    T = Lp // tile
    rows, cols = [], []
    for i in range(T):
        for j in range(i, T):
            rows.append(i)
            cols.append(j)
    npairs = len(rows)

    NC = 2                                        # split pair list over 2 TCs (v7x)
    ppc = -(-npairs // NC)                        # pairs per core
    pad = NC * ppc - npairs
    rows += [0] * pad
    cols += [0] * pad
    row_ids = jnp.asarray(rows, jnp.int32)
    col_ids = jnp.asarray(cols, jnp.int32)

    kernel = functools.partial(
        casamento_kernel, npairs=npairs, ppc=ppc, use_bf16_exp=bool(use_bf16_exp))

    def col_map(c, p, rr, cc):    # (tile, 1) column block of z / w
        return (rr[c * ppc + p], 0)

    def row_map(c, p, rr, cc):    # (1, tile) row block of z / w
        return (0, cc[c * ppc + p])

    def out_map(c, p, rr, cc):    # per-core resident accumulator block
        return (c, 0)

    out = pl.pallas_call(
        kernel,
        out_shape=jax.ShapeDtypeStruct((NC * 8, tile), jnp.float32),
        grid_spec=pltpu.PrefetchScalarGridSpec(
            num_scalar_prefetch=2,
            grid=(NC, ppc),
            in_specs=[
                pl.BlockSpec((tile, 1), col_map),   # z column tile
                pl.BlockSpec((tile, 1), col_map),   # w column tile
                pl.BlockSpec((1, tile), row_map),   # z row tile
                pl.BlockSpec((1, tile), row_map),   # w row tile
            ],
            out_specs=pl.BlockSpec((8, tile), out_map),
        ),
        compiler_params=pltpu.CompilerParams(
            dimension_semantics=("parallel", "arbitrary")),
    )(row_ids, col_ids, zc, wc, zr, wr)

    # Final cross-lane / cross-core reduction done once here (tiny).
    return jnp.sum(out) * jnp.float32(coef)


def casamento_reference(d, y, sig=1.0):
    """Pure-JAX mirror of the PyTorch module for a correctness check."""
    coef = 1.0 / (sig * math.sqrt(2.0 * math.pi))

    def component(a, b):
        diff = (a[:, None] - b[None, :]) / sig
        g = jnp.exp(-0.5 * diff * diff) * coef
        return jnp.sum(g) / (a.shape[0] * b.shape[0])

    return component(y, y) + component(d, d) - 2.0 * component(d, y)


if __name__ == "__main__":
    key = jax.random.PRNGKey(0)
    kd, ky = jax.random.split(key)

    # Small, deliberately non-128-aligned, different-length 1-D vectors.
    d = jax.random.normal(kd, (96,), jnp.float32) * 1.5 + 0.3
    y = jax.random.normal(ky, (80,), jnp.float32)

    loss = casamento_loss(d, y, sig=1.0, use_bf16_exp=False)
    jax.block_until_ready(loss)
    loss_ref = casamento_reference(d, y, sig=1.0)
    assert loss.shape == ()
    assert jnp.abs(loss - loss_ref) < 1e-5, (loss, loss_ref)

    # Multi-tile path (several block pairs, symmetry doubling, padded tail).
    d2 = jax.random.normal(kd, (1000,), jnp.float32) * 2.0 - 0.5
    y2 = jax.random.normal(ky, (700,), jnp.float32) * 0.7
    loss2 = casamento_loss(d2, y2, sig=0.8, use_bf16_exp=False)
    jax.block_until_ready(loss2)
    loss2_ref = casamento_reference(d2, y2, sig=0.8)
    assert jnp.abs(loss2 - loss2_ref) < 5e-5, (loss2, loss2_ref)

    # Fast bf16-exp path (only exercised on chips where it is a win).
    if _bf16_exp_default():
        loss_bf = casamento_loss(d2, y2, sig=0.8, use_bf16_exp=True)
        jax.block_until_ready(loss_bf)
        assert jnp.abs(loss_bf - loss2_ref) < 5e-2, (loss_bf, loss2_ref)

    print("KERNEL_OK")
</pallas_src>

<mosaic_0001>
module attributes {stable_mosaic.version = 11 : i64} {
  func.func @casamento_kernel(%arg0: i32, %arg1: i32, %arg2: memref<2xi32, #tpu.memory_space<smem>>, %arg3: memref<2xi32, #tpu.memory_space<smem>>, %arg4: memref<256x1xf32, #tpu.memory_space<vmem>>, %arg5: memref<256x1xf32, #tpu.memory_space<vmem>>, %arg6: memref<1x256xf32, #tpu.memory_space<vmem>>, %arg7: memref<1x256xf32, #tpu.memory_space<vmem>>, %arg8: memref<8x256xf32, #tpu.memory_space<vmem>>) attributes {dimension_semantics = [#tpu.dimension_semantics<parallel>, #tpu.dimension_semantics<arbitrary>], iteration_bounds = array<i64: 2, 1>, scalar_prefetch = 2 : i64, scratch_operands = 0 : i64, tpu.core_type = #tpu.core_type<tc>, window_params = [{transform_indices = @transform_0, window_bounds = array<i64: 256, 1>}, {transform_indices = @transform_1, window_bounds = array<i64: 256, 1>}, {transform_indices = @transform_2, window_bounds = array<i64: 1, 256>}, {transform_indices = @transform_3, window_bounds = array<i64: 1, 256>}, {transform_indices = @transform_4, window_bounds = array<i64: 8, 256>}]} {
    %c0_i32 = arith.constant 0 : i32
    %0 = arith.cmpi eq, %arg1, %c0_i32 : i32
    %1 = arith.extui %0 : i1 to i32
    %c0_i32_0 = arith.constant 0 : i32
    %2 = arith.cmpi ne, %1, %c0_i32_0 : i32
    scf.if %2 {
      %cst_17 = arith.constant 0.000000e+00 : f32
      %35 = vector.broadcast %cst_17 : f32 to vector<8x256xf32>
      %c0_18 = arith.constant 0 : index
      %c0_19 = arith.constant 0 : index
      %36 = vector.load %arg8[%c0_18, %c0_19] : memref<8x256xf32, #tpu.memory_space<vmem>>, vector<8x256xf32>
      tpu.vector_store %arg8[%c0_18, %c0_19], %35 {strides = array<i32>} : memref<8x256xf32, #tpu.memory_space<vmem>>, vector<8x256xf32>,
    } else {
    }
    %c1_i32 = arith.constant 1 : i32
    %3 = arith.muli %arg0, %c1_i32 : i32
    %4 = arith.addi %3, %arg1 : i32
    %5 = arith.index_cast %4 : i32 to index
    %6 = memref.load %arg2[%5] : memref<2xi32, #tpu.memory_space<smem>>
    %7 = arith.index_cast %4 : i32 to index
    %8 = memref.load %arg3[%7] : memref<2xi32, #tpu.memory_space<smem>>
    %c1_i32_1 = arith.constant 1 : i32
    %9 = arith.cmpi slt, %4, %c1_i32_1 : i32
    %10 = arith.cmpi eq, %6, %8 : i32
    %cst = arith.constant 1.000000e+00 : f32
    %cst_2 = arith.constant 2.000000e+00 : f32
    %11 = arith.select %10, %cst, %cst_2 : f32
    %cst_3 = arith.constant 0.000000e+00 : f32
    %12 = arith.select %9, %11, %cst_3 : f32
    %c0 = arith.constant 0 : index
    %c0_4 = arith.constant 0 : index
    %13 = vector.load %arg4[%c0, %c0_4] : memref<256x1xf32, #tpu.memory_space<vmem>>, vector<256x1xf32>
    %c0_5 = arith.constant 0 : index
    %c0_6 = arith.constant 0 : index
    %14 = vector.load %arg5[%c0_5, %c0_6] : memref<256x1xf32, #tpu.memory_space<vmem>>, vector<256x1xf32>
    %c0_7 = arith.constant 0 : index
    %c0_8 = arith.constant 0 : index
    %15 = vector.load %arg6[%c0_7, %c0_8] : memref<1x256xf32, #tpu.memory_space<vmem>>, vector<1x256xf32>
    %c0_9 = arith.constant 0 : index
    %c0_10 = arith.constant 0 : index
    %16 = vector.load %arg7[%c0_9, %c0_10] : memref<1x256xf32, #tpu.memory_space<vmem>>, vector<1x256xf32>
    %17 = vector.broadcast %13 : vector<256x1xf32> to vector<256x256xf32>
    %18 = vector.broadcast %15 : vector<1x256xf32> to vector<256x256xf32>
    %19 = arith.subf %17, %18 : vector<256x256xf32>
    %20 = arith.mulf %19, %19 : vector<256x256xf32>
    %cst_11 = arith.constant 0.000000e+00 : f32
    %21 = vector.broadcast %cst_11 : f32 to vector<256x256xf32>
    %22 = arith.subf %21, %20 : vector<256x256xf32>
    %23 = math.exp %22 : vector<256x256xf32>
    %24 = vector.broadcast %14 : vector<256x1xf32> to vector<256x256xf32>
    %25 = arith.mulf %24, %23 : vector<256x256xf32>
    %26 = vector.shape_cast %25 : vector<256x256xf32> to vector<32x8x256xf32>
    %cst_12 = arith.constant dense<0.000000e+00> : vector<8x256xf32>
    %27 = vector.multi_reduction <add>, %26, %cst_12 [0] : vector<32x8x256xf32> to vector<8x256xf32>
    %c0_13 = arith.constant 0 : index
    %c0_14 = arith.constant 0 : index
    %28 = vector.load %arg8[%c0_13, %c0_14] : memref<8x256xf32, #tpu.memory_space<vmem>>, vector<8x256xf32>
    %29 = vector.broadcast %12 : f32 to vector<1x256xf32>
    %30 = arith.mulf %29, %16 : vector<1x256xf32>
    %31 = vector.broadcast %30 : vector<1x256xf32> to vector<8x256xf32>
    %32 = arith.mulf %31, %27 : vector<8x256xf32>
    %33 = arith.addf %28, %32 : vector<8x256xf32>
    %c0_15 = arith.constant 0 : index
    %c0_16 = arith.constant 0 : index
    %34 = vector.load %arg8[%c0_15, %c0_16] : memref<8x256xf32, #tpu.memory_space<vmem>>, vector<8x256xf32>
    tpu.vector_store %arg8[%c0_15, %c0_16], %33 {strides = array<i32>} : memref<8x256xf32, #tpu.memory_space<vmem>>, vector<8x256xf32>,
    return
  }
  func.func @transform_0(%arg0: i32, %arg1: i32, %arg2: memref<2xi32, #tpu.memory_space<smem>>, %arg3: memref<2xi32, #tpu.memory_space<smem>>) -> (i32, i32) {
    %c1_i32 = arith.constant 1 : i32
    %0 = arith.muli %arg0, %c1_i32 : i32
    %1 = arith.addi %0, %arg1 : i32
    %2 = arith.index_cast %1 : i32 to index
    %3 = memref.load %arg2[%2] : memref<2xi32, #tpu.memory_space<smem>>
    %c0_i32 = arith.constant 0 : i32
    %c0_i32_0 = arith.constant 0 : i32
    return %3, %c0_i32 : i32, i32
  }
  func.func @transform_1(%arg0: i32, %arg1: i32, %arg2: memref<2xi32, #tpu.memory_space<smem>>, %arg3: memref<2xi32, #tpu.memory_space<smem>>) -> (i32, i32) {
    %c1_i32 = arith.constant 1 : i32
    %0 = arith.muli %arg0, %c1_i32 : i32
    %1 = arith.addi %0, %arg1 : i32
    %2 = arith.index_cast %1 : i32 to index
    %3 = memref.load %arg2[%2] : memref<2xi32, #tpu.memory_space<smem>>
    %c0_i32 = arith.constant 0 : i32
    %c0_i32_0 = arith.constant 0 : i32
    return %3, %c0_i32 : i32, i32
  }
  func.func @transform_2(%arg0: i32, %arg1: i32, %arg2: memref<2xi32, #tpu.memory_space<smem>>, %arg3: memref<2xi32, #tpu.memory_space<smem>>) -> (i32, i32) {
    %c1_i32 = arith.constant 1 : i32
    %0 = arith.muli %arg0, %c1_i32 : i32
    %1 = arith.addi %0, %arg1 : i32
    %2 = arith.index_cast %1 : i32 to index
    %3 = memref.load %arg3[%2] : memref<2xi32, #tpu.memory_space<smem>>
    %c0_i32 = arith.constant 0 : i32
    %c0_i32_0 = arith.constant 0 : i32
    return %c0_i32, %3 : i32, i32
  }
  func.func @transform_3(%arg0: i32, %arg1: i32, %arg2: memref<2xi32, #tpu.memory_space<smem>>, %arg3: memref<2xi32, #tpu.memory_space<smem>>) -> (i32, i32) {
    %c1_i32 = arith.constant 1 : i32
    %0 = arith.muli %arg0, %c1_i32 : i32
    %1 = arith.addi %0, %arg1 : i32
    %2 = arith.index_cast %1 : i32 to index
    %3 = memref.load %arg3[%2] : memref<2xi32, #tpu.memory_space<smem>>
    %c0_i32 = arith.constant 0 : i32
    %c0_i32_0 = arith.constant 0 : i32
    return %c0_i32, %3 : i32, i32
  }
  func.func @transform_4(%arg0: i32, %arg1: i32, %arg2: memref<2xi32, #tpu.memory_space<smem>>, %arg3: memref<2xi32, #tpu.memory_space<smem>>) -> (i32, i32) {
    %c0_i32 = arith.constant 0 : i32
    %c0_i32_0 = arith.constant 0 : i32
    return %arg0, %c0_i32 : i32, i32
  }
}

</mosaic_0001>

<bundles_post_ra>
// kernel: tpu_custom_call.1
= control target key start
LH: loop header
LB: loop body
LE: loop exit
PB: predicated region body
PF: predicated region fallthrough
CT: control target
= control target key end

     0   :  { %s2325_s0 = inlined_call_operand.vmem [shape: s32[2], index: 0, kind: input, shape index: {}]   ;;  %s2326_s2 = inlined_call_operand.vmem [shape: f32[256,1], index: 2, kind: input, shape index: {}]   ;;  %s2327_s3 = inlined_call_operand.vmem [shape: f32[256,1], index: 3, kind: input, shape index: {}]   ;;  %s2328_s4 = inlined_call_operand.vmem [shape: f32[1,256], index: 4, kind: input, shape index: {}]   ;;  %s2329_s5 = inlined_call_operand.vmem [shape: f32[1,256], index: 5, kind: input, shape index: {}]   ;;  %s2330_s6 = inlined_call_operand.hbm [shape: f32[16,256], index: 6, kind: output, shape index: {}]   ;;  %s2331_s1 = inlined_call_operand.vmem [shape: s32[2], index: 1, kind: input, shape index: {}]  }
   0x1   :  { %s11_s23 = sshll.u32 %s2325_s0, 4  ;;  %s15_s26 = sshll.u32 %s2331_s1, 4  ;;  %s12_s23 = int_to_ptr.vmem [resolvable:$true] %s11_s23  ;;  %s16_s26 = int_to_ptr.vmem [resolvable:$true] %s15_s26 }
   0x2   :  { %s1534_s27 = scalar_lea.vmem %s12_s23, 16  ;;  %p1539_p1 = scmp.lt.s32.totalorder %s12_s23, %s12_s23 }
   0x3   :  { %p1535_p0 = scmp.ne.s32.totalorder %s12_s23, %s1534_s27  ;;  %p1540_p2 = scmp.lt.s32.totalorder %s1534_s27, %s1534_s27 }
   0x5   :  { %p1541_p3 = por %p1540_p2, %p1539_p1 }
   0x7   :  { %p1542_p4 = pnand %p1541_p3, %p1535_p0 }
   0x9   :  { %1545 = shalt.err (!%p1542_p4)  }
   0xa   :  { %s1640_s28 = smov [#allocation3]   ;;  %s1546_s29 = scalar_lea.vmem %s16_s26, 16 }
   0xb   :  { %14 = dma.vmem_to_smem %s12_s23, 16, %s1640_s28, [#allocation2] }
   0xc   :  { %p1547_p5 = scmp.ne.s32.totalorder %s16_s26, %s1546_s29  ;;  %p1551_p6 = scmp.lt.s32.totalorder %s16_s26, %s16_s26 }
   0xd   :  { %p1552_p7 = scmp.lt.s32.totalorder %s1546_s29, %s1546_s29 }
   0xf   :  { %p1553_p8 = por %p1552_p7, %p1551_p6 }
  0x11   :  { %p1554_p9 = pnand %p1553_p8, %p1547_p5 }
  0x13   :  { %1557 = shalt.err (!%p1554_p9)  }
  0x14   :  { %s1641_s0 = smov [#allocation4]  }
  0x15   :  { %18 = dma.vmem_to_smem %s16_s26, 16, %s1641_s0, [#allocation2] }
  0x16   :  { %1610 = dma.done.wait [#allocation2], 32 }
  0x17   :  { %1611 = vsyncadd [#allocation2], 4294967264 }
  0x18   :  { %20 = sfence }
  0x19   :  { %21 = vsyncpa [#allocation6], 0 }
  0x1a   :  { %23 = vsyncpa [#allocation6 + $0x1], 0  ;;  %s1685_s1 = smov 0   ;;  %s1687_s30 = smov 0  }
  0x1b   :  { %s1689_s7 = smov 0   ;;  %s1691_s8 = smov 0  }
  0x1c   :  { %s1693_s9 = smov 0   ;;  %s1695_s10 = smov 0  }
  0x1d LB: > { %s1327_s11 = sadd.s32 4294967295, %s1638_s10   ;;  %s1328_s12 = sadd.s32 4294967294, %s1638_s10   ;;  %s1638_s10 = sphi %s1695_s10, %s29_s10   ;;  %s1634_s9 = sphi %s1693_s9, %s2363_s9   ;;  %s1630_s8 = sphi %s1691_s8, %s2362_s8   ;;  %s1626_s7 = sphi %s1689_s7, %s2361_s7   ;;  %s1622_s30 = sphi %s1687_s30, %s2360_s30   ;;  %s1618_s1 = sphi %s1685_s1, %s2359_s1  }
  0x1e   : > { %s41_s13 = sadd.s32 1, %s1634_s9  ;;  %s168_s14 = sadd.s32 1, %s1626_s7 }
  0x1f   : > { %p43_p10 = scmp.ge.s32.totalorder %s41_s13, 2  ;;  %p178_p11 = scmp.ne.s32.totalorder %s1626_s7, %s1622_s30 }
  0x20   : > { %p179_p12 = scmp.eq.s32.totalorder %s1327_s11, 1  ;;  %p184_p13 = scmp.ne.s32.totalorder %s1622_s30, %s1618_s1 }
  0x21   : > { %s2365_s13 = smov (%p43_p10, %s41_s13), 0  ;;  %p185_p1 = scmp.eq.s32.totalorder %s1328_s12, 1 }
  0x22   : > { %p1725_p0 = por %p179_p12, %p178_p11  ;;  %s165_s16 = ssub.s32 %s1634_s9, %s2365_s13 }
  0x23   : > { %p1331_p2 = scmp.ge.s32.totalorder %s1638_s10, 1  ;;  %p166_p3 = scmp.eq.s32.totalorder %s165_s16, 0 }
  0x24   : > { %p1732_p4 = por %p185_p1, %p184_p13  ;;  %p253_p5 = scmp.lt.s32.totalorder %s1638_s10, 3 }
  0x25   : > { %s1738_s18 = scalar_select %p166_p3, %s1626_s7, %s168_s14  }
  0x26   : > { %p254_p6 = pnand %p1331_p2, %p253_p5 }
  0x28   : > { %257 = sbr.rel (%p254_p6) target bundleno = 338 (0x152), region = 36 }
  0x2f   : > { %s301_s19 = sld [smem:[#allocation3 + %s1630_s8]]  ;;  %v1642_v0 = vmov 0   ;;  %p347_p12 = scmp.lt.s32.totalorder %s1630_s8, 1 }
  0x30   : > { %1405 = vset.pattern.permute.xlu1 %v1642_v0  ;;  %1404 = vset.pattern.permute.xlu0 %v1642_v0  ;;  %s311_s25 = sld [smem:[#allocation3 + %s1630_s8]]  ;;  %s297_s29 = sand.u32 1, %s1622_s30  }
  0x31   : > { %s321_s11 = sld [smem:[#allocation4 + %s1630_s8]] }
  0x32   : > { %s2211_s22 = sld [smem:[#allocation4 + %s1630_s8]] }
  0x35   : > { %s1333_s20 = sshll.u32 %s301_s19, 5 }
  0x36   : > { %p303_p7 = scmp.lt.s32.totalorder %s1333_s20, 31  ;;  %s1335_s26 = sshll.u32 %s311_s25, 5 }
  0x37   : > { %p313_p8 = scmp.lt.s32.totalorder %s1335_s26, 31  ;;  %s1337_s12 = sshll.u32 %s321_s11, 1 }
  0x38   : > { %s2367_s20 = smov (!%p303_p7, %s1333_s20), 31  ;;  %p323_p9 = scmp.lt.s32.totalorder %s1337_s12, 1 }
  0x39   : > { %s1334_s21 = sshll.u32 %s2367_s20, 3  ;;  %s2369_s26 = smov (!%p313_p8, %s1335_s26), 31 }
  0x3a   : > { %s1744_s24 = scalar_lea.vmem %s2326_s2, %s1334_s21  ;;  %s1336_s27 = sshll.u32 %s2369_s26, 3 }
  0x3b   : > { %v353_v1 = vld [vmem:[%s1744_s24 + $0x10] sm:$0xff]  ;;  %v351_v2 = vld [vmem:[%s1744_s24] sm:$0xff]  ;;  %v354_v3 = vld [vmem:[%s1744_s24 + $0x18] sm:$0xff]  ;;  %s1780_s0 = scalar_lea.vmem %s2327_s3, %s1336_s27  ;;  %s2371_s12 = smov (!%p323_p9, %s1337_s12), 1 }
  0x3c   : > { %429 = vperm.xlu1 %1405, %v353_v1   ;;  %419 = vperm.xlu0 %1404, %v351_v2   ;;  %v352_v4 = vld [vmem:[%s1744_s24 + $0x8] sm:$0xff]  ;;  %v355_v6 = vld [vmem:[%s1744_s24 + $0x20] sm:$0xff]  ;;  %v358_v7 = vld [vmem:[%s1744_s24 + $0x38] sm:$0xff]  ;;  %v578_v1 = vlaneseq  ;;  %s325_s19 = scalar_lea.vmem %s2328_s4, %s2371_s12  ;;  %s2204_s20 = sld [smem:[#allocation4 + %s1630_s8]] }
  0x3d   : > { %v356_v5 = vld [vmem:[%s1744_s24 + $0x28] sm:$0xff]  ;;  %v357_v8 = vld [vmem:[%s1744_s24 + $0x30] sm:$0xff]  ;;  %v359_v10 = vld [vmem:[%s1744_s24 + $0x40] sm:$0xff]  ;;  %s2208_s21 = sld [smem:[#allocation3 + %s1630_s8]]  ;;  %s1344_s11 = sshll.u32 %s1630_s8, 8 }
  0x3e   : > { %v360_v9 = vld [vmem:[%s1744_s24 + $0x48] sm:$0xff]  ;;  %v362_v11 = vld [vmem:[%s1744_s24 + $0x58] sm:$0xff]  ;;  %v361_v12 = vld [vmem:[%s1744_s24 + $0x50] sm:$0xff]  ;;  %s1643_s8 = smov [#allocation5]  }
  0x3f   : > { %v364_v13 = vld [vmem:[%s1744_s24 + $0x68] sm:$0xff]  ;;  %v363_v14 = vld [vmem:[%s1744_s24 + $0x60] sm:$0xff]  ;;  %v366_v15 = vld [vmem:[%s1744_s24 + $0x78] sm:$0xff] }
  0x40   : > { %434 = vperm.xlu1 %1405, %v354_v3   ;;  %424 = vperm.xlu0 %1404, %v352_v4   ;;  %v365_v16 = vld [vmem:[%s1744_s24 + $0x70] sm:$0xff]  ;;  %v368_v17 = vld [vmem:[%s1744_s24 + $0x88] sm:$0xff]  ;;  %v367_v18 = vld [vmem:[%s1744_s24 + $0x80] sm:$0xff]  ;;  %v1817_v4 = vshrl.u32 %v578_v1, 7 }
  0x41   : > { %v370_v19 = vld [vmem:[%s1744_s24 + $0x98] sm:$0xff]  ;;  %v369_v20 = vld [vmem:[%s1744_s24 + $0x90] sm:$0xff]  ;;  %v372_v21 = vld [vmem:[%s1744_s24 + $0xa8] sm:$0xff] }
  0x42   : > { %v371_v22 = vld [vmem:[%s1744_s24 + $0xa0] sm:$0xff]  ;;  %v374_v23 = vld [vmem:[%s1744_s24 + $0xb8] sm:$0xff]  ;;  %v373_v24 = vld [vmem:[%s1744_s24 + $0xb0] sm:$0xff]  ;;  %2340 = vst [vmem:[#allocation9_spill] sm:$0xff] %v1817_v4  ;;  %s1338_s23 = sshll.u32 %s2204_s20, 1  ;;  %s2276_s20 = scalar_lea.hbm %s2330_s6, %s1344_s11 }
  0x43   : > { %v376_v25 = vld [vmem:[%s1744_s24 + $0xc8] sm:$0xff]  ;;  %v375_v26 = vld [vmem:[%s1744_s24 + $0xc0] sm:$0xff]  ;;  %v378_v27 = vld [vmem:[%s1744_s24 + $0xd8] sm:$0xff]  ;;  %p348_p10 = scmp.eq.s32.totalorder %s2208_s21, %s2211_s22  ;;  %p2240_p11 = scmp.lt.s32.totalorder %s1338_s23, 1 }
  0x44   : > { %444 = vperm.xlu1 %1405, %v356_v5   ;;  %439 = vperm.xlu0 %1404, %v355_v6   ;;  %v377_v28 = vld [vmem:[%s1744_s24 + $0xd0] sm:$0xff]  ;;  %v380_v29 = vld [vmem:[%s1744_s24 + $0xe8] sm:$0xff]  ;;  %v379_v30 = vld [vmem:[%s1744_s24 + $0xe0] sm:$0xff]  ;;  %s1216_s21 = scalar_lea.sflag [#allocation6], %s297_s29 }
  0x45   : > { %v383_v31 = vld [vmem:[%s1780_s0] sm:$0xff]  ;;  %v381_v32 = vld [vmem:[%s1744_s24 + $0xf0] sm:$0xff]  ;;  %v384_v34 = vld [vmem:[%s1780_s0 + $0x8] sm:$0xff]  ;;  %s349_s25 = scalar_select %p348_p10, 1.0, 2.0 }
  0x46   : > { %v385_v33 = vld [vmem:[%s1780_s0 + $0x10] sm:$0xff]  ;;  %v387_v35 = vld [vmem:[%s1780_s0 + $0x20] sm:$0xff]  ;;  %v386_v36 = vld [vmem:[%s1780_s0 + $0x18] sm:$0xff]  ;;  %s2373_s23 = smov (!%p2240_p11, %s1338_s23), 1 }
  0x47   : > { %v389_v37 = vld [vmem:[%s1780_s0 + $0x30] sm:$0xff]  ;;  %v388_v38 = vld [vmem:[%s1780_s0 + $0x28] sm:$0xff]  ;;  %v391_v39 = vld [vmem:[%s1780_s0 + $0x40] sm:$0xff]  ;;  %s2375_s25 = smov (!%p347_p12, %s349_s25), 0.0  ;;  %s334_s28 = scalar_lea.vmem %s2329_s5, %s2373_s23 }
  0x48   : > { %454 = vperm.xlu1 %1405, %v358_v7   ;;  %449 = vperm.xlu0 %1404, %v357_v8   ;;  %v390_v40 = vld [vmem:[%s1780_s0 + $0x38] sm:$0xff]  ;;  %v393_v41 = vld [vmem:[%s1780_s0 + $0x50] sm:$0xff]  ;;  %v392_v42 = vld [vmem:[%s1780_s0 + $0x48] sm:$0xff]  ;;  %v2333_v7 = vsub.s32 0, %v1817_v4  ;;  %s1562_s23 = sshll.u32 %s1643_s8, 4  ;;  %s1563_s23 = int_to_ptr.vmem [resolvable:$false] %s1562_s23 }
  0x49   : > { %v395_v43 = vld [vmem:[%s1780_s0 + $0x60] sm:$0xff]  ;;  %v394_v44 = vld [vmem:[%s1780_s0 + $0x58] sm:$0xff]  ;;  %v397_v45 = vld [vmem:[%s1780_s0 + $0x70] sm:$0xff] }
  0x4a   : > { %v396_v46 = vld [vmem:[%s1780_s0 + $0x68] sm:$0xff]  ;;  %v399_v47 = vld [vmem:[%s1780_s0 + $0x80] sm:$0xff]  ;;  %v398_v48 = vld [vmem:[%s1780_s0 + $0x78] sm:$0xff] }
  0x4b   : > { %v401_v49 = vld [vmem:[%s1780_s0 + $0x90] sm:$0xff]  ;;  %v400_v50 = vld [vmem:[%s1780_s0 + $0x88] sm:$0xff]  ;;  %v403_v51 = vld [vmem:[%s1780_s0 + $0xa0] sm:$0xff] }
  0x4c   : > { %464 = vperm.xlu1 %1405, %v360_v9   ;;  %459 = vperm.xlu0 %1404, %v359_v10   ;;  %v402_v52 = vld [vmem:[%s1780_s0 + $0x98] sm:$0xff]  ;;  %v404_v54 = vld [vmem:[%s1780_s0 + $0xa8] sm:$0xff]  ;;  %v405_v56 = vld [vmem:[%s1780_s0 + $0xb0] sm:$0xff]  ;;  %v2332_v9 = vsub.s32 1, %v1817_v4 }
  0x4d   : > { %v382_v53 = vld [vmem:[%s1744_s24 + $0xf8] sm:$0xff]  ;;  %v408_v57 = vld [vmem:[%s1780_s0 + $0xc8] sm:$0xff]  ;;  %v407_v58 = vld [vmem:[%s1780_s0 + $0xc0] sm:$0xff]  ;;  %s1564_s24 = scalar_lea.vmem %s1563_s23, 512 }
  0x4e   : > { %v406_v55 = vld [vmem:[%s1780_s0 + $0xb8] sm:$0xff]  ;;  %v409_v60 = vld [vmem:[%s1780_s0 + $0xd0] sm:$0xff]  ;;  %v412_v61 = vld [vmem:[%s1780_s0 + $0xe8] sm:$0xff] }
  0x4f   : > { %v410_v59 = vld [vmem:[%s1780_s0 + $0xd8] sm:$0xff]  ;;  %v411_v62 = vld [vmem:[%s1780_s0 + $0xe0] sm:$0xff]  ;;  %v413_v0 = vld [vmem:[%s1780_s0 + $0xf0] sm:$0xff] }
  0x50   : > { %474 = vperm.xlu1 %1405, %v362_v11   ;;  %469 = vperm.xlu0 %1404, %v361_v12   ;;  %v414_v63 = vld [vmem:[%s1780_s0 + $0xf8] sm:$0xff]  ;;  %v415_v8 = vld [vmem:[%s325_s19] sm:$0x3]  ;;  %s1332_s0 = sshll.u32 %s297_s29, 4 }
  0x51   : > { %v1826_v12 = vrot.slane %v415_v8, %v2333_v7  ;;  %s299_s12 = scalar_lea.vmem [#allocation5], %s1332_s0 }
  0x52   : > { %s1230_s14 = sshll.u32 %s299_s12, 4  ;;  %s2278_s14 = int_to_ptr.vmem [resolvable:$true] %s1230_s14 }
  0x53   : > { %s1558_s22 = scalar_lea.vmem %s2278_s14, 256  ;;  %p1565_p3 = scmp.lt.s32.totalorder %s2278_s14, %s1563_s23 }
  0x54   : > { %484 = vperm.xlu1 %1405, %v364_v13   ;;  %479 = vperm.xlu0 %1404, %v363_v14   ;;  %v1830_v13 = vrot.slane %v415_v8, %v2332_v9  ;;  %p1559_p13 = scmp.ne.s32.totalorder %s2278_s14, %s1558_s22  ;;  %p1566_p5 = scmp.lt.s32.totalorder %s1564_s24, %s1558_s22 }
  0x56   : > { %p1560_p1 = pnand %p1559_p13, %p1725_p0  ;;  %p1567_p6 = por %p1566_p5, %p1565_p3 }
  0x58   : > { %494 = vperm.xlu1 %1405, %v366_v15   ;;  %489 = vperm.xlu0 %1404, %v365_v16   ;;  %p1561_p2 = pneg %p1560_p1 }
  0x5a   : > { %p1568_p7 = pnand %p1567_p6, %p1561_p2 }
  0x5c   : > { %504 = vperm.xlu1 %1405, %v368_v17   ;;  %499 = vperm.xlu0 %1404, %v367_v18  }
  0x60   : > { %514 = vperm.xlu1 %1405, %v370_v19   ;;  %509 = vperm.xlu0 %1404, %v369_v20  }
  0x64   : > { %524 = vperm.xlu1 %1405, %v372_v21   ;;  %519 = vperm.xlu0 %1404, %v371_v22  }
  0x68   : > { %534 = vperm.xlu1 %1405, %v374_v23   ;;  %529 = vperm.xlu0 %1404, %v373_v24  }
  0x6c   : > { %544 = vperm.xlu1 %1405, %v376_v25   ;;  %539 = vperm.xlu0 %1404, %v375_v26  }
  0x70   : > { %554 = vperm.xlu1 %1405, %v378_v27   ;;  %549 = vperm.xlu0 %1404, %v377_v28  }
  0x74   : > { %564 = vperm.xlu1 %1405, %v380_v29   ;;  %559 = vperm.xlu0 %1404, %v379_v30  }
  0x78   : > { %910 = vperm.xlu1 %1405, %v383_v31   ;;  %569 = vperm.xlu0 %1404, %v381_v32  }
  0x7c   : > { %920 = vperm.xlu1 %1405, %v385_v33   ;;  %915 = vperm.xlu0 %1404, %v384_v34  }
  0x80   : > { %930 = vperm.xlu1 %1405, %v387_v35   ;;  %925 = vperm.xlu0 %1404, %v386_v36  }
  0x84   : > { %940 = vperm.xlu1 %1405, %v389_v37   ;;  %935 = vperm.xlu0 %1404, %v388_v38  }
  0x88   : > { %950 = vperm.xlu1 %1405, %v391_v39   ;;  %945 = vperm.xlu0 %1404, %v390_v40  }
  0x8c   : > { %960 = vperm.xlu1 %1405, %v393_v41   ;;  %955 = vperm.xlu0 %1404, %v392_v42  }
  0x90   : > { %970 = vperm.xlu1 %1405, %v395_v43   ;;  %965 = vperm.xlu0 %1404, %v394_v44  }
  0x94   : > { %980 = vperm.xlu1 %1405, %v397_v45   ;;  %975 = vperm.xlu0 %1404, %v396_v46  }
  0x98   : > { %990 = vperm.xlu1 %1405, %v399_v47   ;;  %985 = vperm.xlu0 %1404, %v398_v48  }
  0x9c   : > { %1000 = vperm.xlu1 %1405, %v401_v49   ;;  %995 = vperm.xlu0 %1404, %v400_v50  }
  0xa0   : > { %1010 = vperm.xlu1 %1405, %v403_v51   ;;  %1005 = vperm.xlu0 %1404, %v402_v52  }
  0xa4   : > { %574 = vperm.xlu1 %1405, %v382_v53   ;;  %1015 = vperm.xlu0 %1404, %v404_v54  }
  0xa8   : > { %1025 = vperm.xlu1 %1405, %v406_v55   ;;  %1020 = vperm.xlu0 %1404, %v405_v56  }
  0xac   : > { %1035 = vperm.xlu1 %1405, %v408_v57   ;;  %1030 = vperm.xlu0 %1404, %v407_v58  }
  0xb0   : > { %1045 = vperm.xlu1 %1405, %v410_v59   ;;  %1040 = vperm.xlu0 %1404, %v409_v60  }
  0xb4   : > { %1055 = vperm.xlu1 %1405, %v412_v61   ;;  %1050 = vperm.xlu0 %1404, %v411_v62  }
  0xb8   : > { %1065 = vperm.xlu1 %1405, %v414_v63   ;;  %1060 = vperm.xlu0 %1404, %v413_v0  }
  0xbb   : > { %v430_v2 = vpop.permute.xlu1 %429  ;;  %v420_v3 = vpop.permute.xlu0 %419 }
  0xbc   : > { %v592_v14 = vsub.f32 %v430_v2, %v1826_v12  ;;  %v593_v17 = vsub.f32 %v430_v2, %v1830_v13  ;;  %v588_v18 = vsub.f32 %v420_v3, %v1826_v12  ;;  %v589_v19 = vsub.f32 %v420_v3, %v1830_v13 }
  0xbe   : > { %v656_v20 = vmul.f32 %v592_v14, %v592_v14  ;;  %v657_v24 = vmul.f32 %v593_v17, %v593_v17  ;;  %v652_v26 = vmul.f32 %v588_v18, %v588_v18  ;;  %v653_v28 = vmul.f32 %v589_v19, %v589_v19 }
  0xbf   : > { %v435_v5 = vpop.permute.xlu1 %434  ;;  %v425_v6 = vpop.permute.xlu0 %424 }
  0xc0   : > { %v594_v21 = vsub.f32 %v435_v5, %v1826_v12  ;;  %v595_v25 = vsub.f32 %v435_v5, %v1830_v13  ;;  %v590_v27 = vsub.f32 %v425_v6, %v1826_v12  ;;  %v591_v29 = vsub.f32 %v425_v6, %v1830_v13 }
  0xc1   : > { %v720_v30 = vsub.f32 0.0, %v656_v20  ;;  %v721_v35 = vsub.f32 0.0, %v657_v24  ;;  %v716_v38 = vsub.f32 0.0, %v652_v26  ;;  %v717_v40 = vsub.f32 0.0, %v653_v28 }
  0xc2   : > { %v658_v31 = vmul.f32 %v594_v21, %v594_v21  ;;  %v659_v36 = vmul.f32 %v595_v25, %v595_v25  ;;  %v654_v39 = vmul.f32 %v590_v27, %v590_v27  ;;  %v655_v41 = vmul.f32 %v591_v29, %v591_v29 }
  0xc3   : > { %v445_v10 = vpop.permute.xlu1 %444  ;;  %v440_v11 = vpop.permute.xlu0 %439  ;;  %v788_v42 = vmul.f32 1.442695, %v720_v30  ;;  %v790_v48 = vmul.f32 1.442695, %v721_v35  ;;  %v780_v52 = vmul.f32 1.442695, %v716_v38 }
  0xc4   : > { %v598_v32 = vsub.f32 %v445_v10, %v1826_v12  ;;  %v599_v37 = vsub.f32 %v445_v10, %v1830_v13  ;;  %v722_v43 = vsub.f32 0.0, %v658_v31  ;;  %v596_v45 = vsub.f32 %v440_v11, %v1826_v12 }
  0xc5   : > { %v723_v49 = vsub.f32 0.0, %v659_v36  ;;  %v597_v51 = vsub.f32 %v440_v11, %v1830_v13  ;;  %v718_v53 = vsub.f32 0.0, %v654_v39  ;;  %v782_v55 = vmul.f32 1.442695, %v717_v40 }
  0xc6   : > { %v662_v44 = vmul.f32 %v598_v32, %v598_v32  ;;  %v663_v50 = vmul.f32 %v599_v37, %v599_v37  ;;  %v719_v56 = vsub.f32 0.0, %v655_v41  ;;  %1406 = vpow2.f32 %v788_v42 }
  0xc7   : > { %v455_v15 = vpop.permute.xlu1 %454  ;;  %v450_v16 = vpop.permute.xlu0 %449  ;;  %v792_v58 = vmul.f32 1.442695, %v722_v43  ;;  %v660_v60 = vmul.f32 %v596_v45, %v596_v45  ;;  %1408 = vpow2.f32 %v790_v48  ;;  %v794_v63 = vmul.f32 1.442695, %v723_v49 }
  0xc8   : > { %v602_v54 = vsub.f32 %v455_v15, %v1826_v12  ;;  %v603_v57 = vsub.f32 %v455_v15, %v1830_v13  ;;  %v726_v59 = vsub.f32 0.0, %v662_v44  ;;  %v727_v0 = vsub.f32 0.0, %v663_v50 }
  0xc9   : > { %v661_v1 = vmul.f32 %v597_v51, %v597_v51  ;;  %1410 = vpow2.f32 %v780_v52  ;;  %v784_v2 = vmul.f32 1.442695, %v718_v53  ;;  %v600_v5 = vsub.f32 %v450_v16, %v1826_v12 }
  0xca   : > { %v666_v3 = vmul.f32 %v602_v54, %v602_v54  ;;  %1412 = vpow2.f32 %v782_v55  ;;  %v786_v6 = vmul.f32 1.442695, %v719_v56  ;;  %v667_v8 = vmul.f32 %v603_v57, %v603_v57 }
  0xcb   : > { %v1837_v22 = vpop.permute.xlu1 %464  ;;  %v1839_v23 = vpop.permute.xlu0 %459  ;;  %v601_v10 = vsub.f32 %v450_v16, %v1830_v13  ;;  %1414 = vpow2.f32 %v792_v58  ;;  %v800_v11 = vmul.f32 1.442695, %v726_v59  ;;  %v724_v14 = vsub.f32 0.0, %v660_v60 }
  0xcc   : > { %v606_v15 = vsub.f32 %v1837_v22, %v1826_v12  ;;  %1416 = vpow2.f32 %v794_v63  ;;  %v802_v19 = vmul.f32 1.442695, %v727_v0  ;;  %v725_v20 = vsub.f32 0.0, %v661_v1 }
  0xcd   : > { %v607_v21 = vsub.f32 %v1837_v22, %v1830_v13  ;;  %1418 = vpow2.f32 %v784_v2  ;;  %v730_v24 = vsub.f32 0.0, %v666_v3  ;;  %v664_v25 = vmul.f32 %v600_v5, %v600_v5 }
  0xce   : > { %v604_v16 = vsub.f32 %v1839_v23, %v1826_v12  ;;  %1420 = vpow2.f32 %v786_v6  ;;  %v731_v26 = vsub.f32 0.0, %v667_v8  ;;  %v665_v27 = vmul.f32 %v601_v10, %v601_v10 }
  0xcf   : > { %v1845_v33 = vpop.permute.xlu1 %474  ;;  %v1847_v34 = vpop.permute.xlu0 %469  ;;  %v605_v28 = vsub.f32 %v1839_v23, %v1830_v13  ;;  %1422 = vpow2.f32 %v800_v11  ;;  %v796_v29 = vmul.f32 1.442695, %v724_v14  ;;  %v670_v30 = vmul.f32 %v606_v15, %v606_v15 }
  0xd0   : > { %v610_v31 = vsub.f32 %v1845_v33, %v1826_v12  ;;  %1424 = vpow2.f32 %v802_v19  ;;  %v798_v35 = vmul.f32 1.442695, %v725_v20  ;;  %v671_v36 = vmul.f32 %v607_v21, %v607_v21  ;;  %v1884_v38 = vpop.eup %1406 }
  0xd1   : > { %v611_v37 = vsub.f32 %v1845_v33, %v1830_v13  ;;  %v808_v39 = vmul.f32 1.442695, %v730_v24  ;;  %v728_v23 = vsub.f32 0.0, %v664_v25  ;;  %v668_v40 = vmul.f32 %v604_v16, %v604_v16  ;;  %v1888_v42 = vpop.eup %1408 }
  0xd2   : > { %v608_v41 = vsub.f32 %v1847_v34, %v1826_v12  ;;  %v810_v43 = vmul.f32 1.442695, %v731_v26  ;;  %v729_v44 = vsub.f32 0.0, %v665_v27  ;;  %v669_v45 = vmul.f32 %v605_v28, %v605_v28 }
  0xd3   : > { %v1851_v46 = vpop.permute.xlu1 %484  ;;  %v1853_v47 = vpop.permute.xlu0 %479  ;;  %v609_v48 = vsub.f32 %v1847_v34, %v1830_v13  ;;  %1426 = vpow2.f32 %v796_v29  ;;  %v734_v33 = vsub.f32 0.0, %v670_v30  ;;  %v674_v50 = vmul.f32 %v610_v31, %v610_v31 }
  0xd4   : > { %v1892_v49 = vpop.eup %1410  ;;  %v614_v51 = vsub.f32 %v1851_v46, %v1826_v12  ;;  %1428 = vpow2.f32 %v798_v35  ;;  %v735_v55 = vsub.f32 0.0, %v671_v36  ;;  %v675_v56 = vmul.f32 %v611_v37, %v611_v37 }
  0xd5   : > { %v1900_v54 = vpop.eup %1412  ;;  %v615_v34 = vsub.f32 %v1851_v46, %v1830_v13  ;;  %1430 = vpow2.f32 %v808_v39  ;;  %v804_v58 = vmul.f32 1.442695, %v728_v23  ;;  %v732_v59 = vsub.f32 0.0, %v668_v40 }
  0xd6   : > { %v1904_v57 = vpop.eup %1414  ;;  %v672_v60 = vmul.f32 %v608_v41, %v608_v41  ;;  %v806_v0 = vmul.f32 1.442695, %v729_v44  ;;  %v733_v1 = vsub.f32 0.0, %v669_v45  ;;  %v673_v2 = vmul.f32 %v609_v48, %v609_v48 }
  0xd7   : > { %v1858_v61 = vpop.permute.xlu1 %494  ;;  %v1860_v62 = vpop.permute.xlu0 %489  ;;  %v612_v3 = vsub.f32 %v1853_v47, %v1826_v12  ;;  %1432 = vpow2.f32 %v810_v43  ;;  %v816_v6 = vmul.f32 1.442695, %v734_v33  ;;  %v738_v8 = vsub.f32 0.0, %v674_v50 }
  0xd8   : > { %v1906_v63 = vpop.eup %1416  ;;  %v678_v46 = vmul.f32 %v614_v51, %v614_v51  ;;  %v818_v15 = vmul.f32 1.442695, %v735_v55  ;;  %v739_v19 = vsub.f32 0.0, %v675_v56  ;;  %v679_v20 = vmul.f32 %v615_v34, %v615_v34 }
  0xd9   : > { %v1910_v5 = vpop.eup %1418  ;;  %v613_v21 = vsub.f32 %v1853_v47, %v1830_v13  ;;  %1434 = vpow2.f32 %v804_v58  ;;  %v812_v25 = vmul.f32 1.442695, %v732_v59  ;;  %v736_v16 = vsub.f32 0.0, %v672_v60 }
  0xda   : > { %v1916_v14 = vpop.eup %1420  ;;  %v618_v26 = vsub.f32 %v1858_v61, %v1826_v12  ;;  %1436 = vpow2.f32 %v806_v0  ;;  %v814_v28 = vmul.f32 1.442695, %v733_v1  ;;  %v737_v29 = vsub.f32 0.0, %v673_v2 }
  0xdb   : > { %v1866_v17 = vpop.permute.xlu1 %504  ;;  %v1868_v18 = vpop.permute.xlu0 %499  ;;  %v676_v30 = vmul.f32 %v612_v3, %v612_v3  ;;  %1438 = vpow2.f32 %v816_v6  ;;  %v824_v31 = vmul.f32 1.442695, %v738_v8  ;;  %v742_v35 = vsub.f32 0.0, %v678_v46 }
  0xdc   : > { %v1920_v24 = vpop.eup %1422  ;;  %v619_v47 = vsub.f32 %v1858_v61, %v1830_v13  ;;  %1440 = vpow2.f32 %v818_v15  ;;  %v826_v39 = vmul.f32 1.442695, %v739_v19  ;;  %v743_v23 = vsub.f32 0.0, %v679_v20 }
  0xdd   : > { %v1924_v27 = vpop.eup %1424  ;;  %v677_v40 = vmul.f32 %v613_v21, %v613_v21  ;;  %1442 = vpow2.f32 %v812_v25  ;;  %v820_v43 = vmul.f32 1.442695, %v736_v16  ;;  %v682_v44 = vmul.f32 %v618_v26, %v618_v26 }
  0xde   : > { %v1932_v41 = vpop.eup %1426  ;;  %v616_v45 = vsub.f32 %v1860_v62, %v1826_v12  ;;  %1444 = vpow2.f32 %v814_v28  ;;  %v822_v61 = vmul.f32 1.442695, %v737_v29  ;;  %v740_v33 = vsub.f32 0.0, %v676_v30 }
  0xdf   : > { %v1878_v32 = vpop.permute.xlu1 %514  ;;  %v1880_v22 = vpop.permute.xlu0 %509  ;;  %v617_v50 = vsub.f32 %v1860_v62, %v1830_v13  ;;  %1446 = vpow2.f32 %v824_v31  ;;  %v832_v55 = vmul.f32 1.442695, %v742_v35  ;;  %v683_v56 = vmul.f32 %v619_v47, %v619_v47 }
  0xe0   : > { %v1936_v48 = vpop.eup %1428  ;;  %v622_v34 = vsub.f32 %v1866_v17, %v1826_v12  ;;  %1448 = vpow2.f32 %v826_v39  ;;  %v834_v60 = vmul.f32 1.442695, %v743_v23  ;;  %v741_v0 = vsub.f32 0.0, %v677_v40 }
  0xe1   : > { %v1940_v51 = vpop.eup %1430  ;;  %v623_v1 = vsub.f32 %v1866_v17, %v1830_v13  ;;  %1450 = vpow2.f32 %v820_v43  ;;  %v746_v62 = vsub.f32 0.0, %v682_v44  ;;  %v680_v3 = vmul.f32 %v616_v45, %v616_v45 }
  0xe2   : > { %v1950_v2 = vpop.eup %1432  ;;  %v620_v6 = vsub.f32 %v1868_v18, %v1826_v12  ;;  %1452 = vpow2.f32 %v822_v61  ;;  %v828_v8 = vmul.f32 1.442695, %v740_v33  ;;  %v681_v46 = vmul.f32 %v617_v50, %v617_v50 }
  0xe3   : > { %v1896_v52 = vpop.permute.xlu1 %524  ;;  %v1898_v53 = vpop.permute.xlu0 %519  ;;  %v621_v15 = vsub.f32 %v1868_v18, %v1830_v13  ;;  %1454 = vpow2.f32 %v832_v55  ;;  %v747_v20 = vsub.f32 0.0, %v683_v56  ;;  %v686_v21 = vmul.f32 %v622_v34, %v622_v34 }
  0xe4   : > { %v1956_v19 = vpop.eup %1434  ;;  %v626_v17 = vsub.f32 %v1878_v32, %v1826_v12  ;;  %1456 = vpow2.f32 %v834_v60  ;;  %v830_v28 = vmul.f32 1.442695, %v741_v0  ;;  %v687_v29 = vmul.f32 %v623_v1, %v623_v1 }
  0xe5   : > { %v1964_v26 = vpop.eup %1436  ;;  %v627_v18 = vsub.f32 %v1878_v32, %v1830_v13  ;;  %v840_v31 = vmul.f32 1.442695, %v746_v62  ;;  %v744_v35 = vsub.f32 0.0, %v680_v3  ;;  %v684_v47 = vmul.f32 %v620_v6, %v620_v6 }
  0xe6   : > { %v1968_v30 = vpop.eup %1438  ;;  %v624_v39 = vsub.f32 %v1880_v22, %v1826_v12  ;;  %1458 = vpow2.f32 %v828_v8  ;;  %v745_v40 = vsub.f32 0.0, %v681_v46  ;;  %v685_v43 = vmul.f32 %v621_v15, %v621_v15 }
  0xe7   : > { %v1912_v10 = vpop.permute.xlu1 %534  ;;  %v1914_v11 = vpop.permute.xlu0 %529  ;;  %v625_v44 = vsub.f32 %v1880_v22, %v1830_v13  ;;  %v842_v61 = vmul.f32 1.442695, %v747_v20  ;;  %v750_v32 = vsub.f32 0.0, %v686_v21  ;;  %v690_v33 = vmul.f32 %v626_v17, %v626_v17 }
  0xe8   : > { %v1972_v23 = vpop.eup %1440  ;;  %v630_v50 = vsub.f32 %v1896_v52, %v1826_v12  ;;  %1460 = vpow2.f32 %v830_v28  ;;  %v751_v60 = vsub.f32 0.0, %v687_v29  ;;  %v691_v0 = vmul.f32 %v627_v18, %v627_v18 }
  0xe9   : > { %v1976_v45 = vpop.eup %1442  ;;  %v631_v22 = vsub.f32 %v1896_v52, %v1830_v13  ;;  %v836_v62 = vmul.f32 1.442695, %v744_v35  ;;  %v748_v3 = vsub.f32 0.0, %v684_v47  ;;  %v688_v6 = vmul.f32 %v624_v39, %v624_v39 }
  0xea   : > { %v1984_v34 = vpop.eup %1444  ;;  %v628_v8 = vsub.f32 %v1898_v53, %v1826_v12  ;;  %1462 = vpow2.f32 %v840_v31  ;;  %v838_v15 = vmul.f32 1.442695, %v745_v40  ;;  %v749_v20 = vsub.f32 0.0, %v685_v43 }
  0xeb   : > { %v1928_v36 = vpop.permute.xlu1 %544  ;;  %v1930_v37 = vpop.permute.xlu0 %539  ;;  %v689_v21 = vmul.f32 %v625_v44, %v625_v44  ;;  %v848_v28 = vmul.f32 1.442695, %v750_v32  ;;  %v754_v29 = vsub.f32 0.0, %v690_v33  ;;  %v694_v18 = vmul.f32 %v630_v50, %v630_v50 }
  0xec   : > { %v1988_v1 = vpop.eup %1446  ;;  %v629_v52 = vsub.f32 %v1898_v53, %v1830_v13  ;;  %1464 = vpow2.f32 %v842_v61  ;;  %v850_v9 = vmul.f32 1.442695, %v751_v60  ;;  %v755_v31 = vsub.f32 0.0, %v691_v0 }
  0xed   : > { %v1992_v46 = vpop.eup %1448  ;;  %v695_v40 = vmul.f32 %v631_v22, %v631_v22  ;;  %1466 = vpow2.f32 %v836_v62  ;;  %v844_v44 = vmul.f32 1.442695, %v748_v3  ;;  %v752_v32 = vsub.f32 0.0, %v688_v6 }
  0xee   : > { %v1994_v17 = vpop.eup %1450  ;;  %v692_v33 = vmul.f32 %v628_v8, %v628_v8  ;;  %1468 = vpow2.f32 %v838_v15  ;;  %v846_v53 = vmul.f32 1.442695, %v749_v20  ;;  %v753_v7 = vsub.f32 0.0, %v689_v21 }
  0xef   : > { %v1944_v58 = vpop.permute.xlu1 %554  ;;  %v1946_v59 = vpop.permute.xlu0 %549  ;;  %v634_v4 = vsub.f32 %v1912_v10, %v1826_v12  ;;  %1470 = vpow2.f32 %v848_v28  ;;  %v758_v61 = vsub.f32 0.0, %v694_v18  ;;  %v693_v60 = vmul.f32 %v629_v52, %v629_v52 }
  0xf0   : > { %v2002_v39 = vpop.eup %1452  ;;  %1472 = vpow2.f32 %v850_v9  ;;  %v858_v62 = vmul.f32 1.442695, %v755_v31  ;;  %v759_v3 = vsub.f32 0.0, %v695_v40  ;;  %v852_v6 = vmul.f32 1.442695, %v752_v32 }
  0xf1   : > { %v2004_v43 = vpop.eup %1454  ;;  %1474 = vpow2.f32 %v844_v44  ;;  %v756_v8 = vsub.f32 0.0, %v692_v33  ;;  %v635_v15 = vsub.f32 %v1912_v10, %v1830_v13  ;;  %v854_v21 = vmul.f32 1.442695, %v753_v7 }
  0xf2   : > { %v2006_v50 = vpop.eup %1456  ;;  %1476 = vpow2.f32 %v846_v53  ;;  %v698_v28 = vmul.f32 %v634_v4, %v634_v4  ;;  %v757_v18 = vsub.f32 0.0, %v693_v60  ;;  %v632_v52 = vsub.f32 %v1914_v11, %v1826_v12 }
  0xf3   : > { %v1960_v25 = vpop.permute.xlu1 %564  ;;  %v1962_v16 = vpop.permute.xlu0 %559  ;;  %v866_v44 = vmul.f32 1.442695, %v759_v3  ;;  %v860_v10 = vmul.f32 1.442695, %v756_v8  ;;  %v699_v32 = vmul.f32 %v635_v15, %v635_v15  ;;  %v633_v7 = vsub.f32 %v1914_v11, %v1830_v13 }
  0xf4   : > { %2341 = vst [vmem:[#allocation10_spill] sm:$0xff] %v1962_v16  ;;  %v2012_v16 = vpop.eup %1458  ;;  %v762_v4 = vsub.f32 0.0, %v698_v28  ;;  %v862_v53 = vmul.f32 1.442695, %v757_v18  ;;  %v638_v3 = vsub.f32 %v1928_v36, %v1826_v12 }
  0xf5   : > { %v2016_v20 = vpop.eup %1460  ;;  %v763_v8 = vsub.f32 0.0, %v699_v32 }
  0xf6   : > { %v2024_v40 = vpop.eup %1462  ;;  %v872_v15 = vmul.f32 1.442695, %v762_v4 }
  0xf7   : > { %v1980_v55 = vpop.permute.xlu1 %910  ;;  %v1982_v56 = vpop.permute.xlu0 %569  ;;  %2343 = vst [vmem:[#allocation12_spill] sm:$0xff] %v2024_v40 }
  0xf8   : > { %2342 = vst [vmem:[#allocation11_spill] sm:$0xff] %v1982_v56  ;;  %v856_v56 = vmul.f32 1.442695, %v754_v29  ;;  %v864_v29 = vmul.f32 1.442695, %v758_v61  ;;  %v2026_v33 = vpop.eup %1464  ;;  %v696_v61 = vmul.f32 %v632_v52, %v632_v52  ;;  %v1068_v28 = vmul.f32 %v1892_v49, %v1980_v55 }
  0xf9   : > { %v639_v49 = vsub.f32 %v1928_v36, %v1830_v13  ;;  %v636_v36 = vsub.f32 %v1930_v37, %v1826_v12 }
  0xfa   : > { %1478 = vpow2.f32 %v856_v56  ;;  %v2030_v56 = vpop.eup %1466  ;;  %v760_v52 = vsub.f32 0.0, %v696_v61 }
  0xfb   : > { %v1998_v35 = vpop.permute.xlu1 %920  ;;  %v2000_v47 = vpop.permute.xlu0 %915  ;;  %1480 = vpow2.f32 %v858_v62 }
  0xfc   : > { %1482 = vpow2.f32 %v852_v6  ;;  %v2036_v62 = vpop.eup %1468 }
  0xfd   : > { %1484 = vpow2.f32 %v854_v21  ;;  %v2040_v6 = vpop.eup %1470  ;;  %v697_v21 = vmul.f32 %v633_v7, %v633_v7 }
  0xfe   : > { %1486 = vpow2.f32 %v864_v29  ;;  %2344 = vst [vmem:[#allocation13_spill] sm:$0xff] %v2040_v6  ;;  %v2042_v11 = vpop.eup %1472  ;;  %v1070_v29 = vmul.f32 %v1910_v5, %v2000_v47  ;;  %v702_v5 = vmul.f32 %v638_v3, %v638_v3 }
  0xff   : > { %v2010_v0 = vpop.permute.xlu1 %930  ;;  %v926_v22 = vpop.permute.xlu0 %925  ;;  %1488 = vpow2.f32 %v866_v44  ;;  %2345 = vst [vmem:[#allocation14_spill] sm:$0xff] %v2042_v11  ;;  %v1069_v44 = vmul.f32 %v1900_v54, %v1980_v55  ;;  %v1073_v54 = vmul.f32 %v1888_v42, %v1998_v35  ;;  %v637_v42 = vsub.f32 %v1930_v37, %v1830_v13 }
 0x100   : > { %1490 = vpow2.f32 %v860_v10  ;;  %v2048_v18 = vpop.eup %1474  ;;  %v1071_v10 = vmul.f32 %v1916_v14, %v2000_v47  ;;  %v1132_v61 = vadd.f32 %v1070_v29, %v1068_v28  ;;  %v1074_v55 = vmul.f32 %v1904_v57, %v926_v22 }
 0x101   : > { %2346 = vst [vmem:[#allocation15_spill] sm:$0xff] %v2048_v18  ;;  %1492 = vpow2.f32 %v862_v53  ;;  %v2058_v7 = vpop.eup %1476  ;;  %v1072_v53 = vmul.f32 %v1884_v38, %v1998_v35  ;;  %v1075_v47 = vmul.f32 %v1906_v63, %v926_v22  ;;  %v761_v18 = vsub.f32 0.0, %v697_v21 }
 0x102   : > { %2347 = vst [vmem:[#allocation16_spill] sm:$0xff] %v2058_v7  ;;  %v1163_v14 = vadd.f32 %v1071_v10, %v1069_v44  ;;  %v874_v7 = vmul.f32 1.442695, %v763_v8  ;;  %1494 = vpow2.f32 %v872_v15  ;;  %v868_v28 = vmul.f32 1.442695, %v760_v52 }
 0x103   : > { %v2020_v9 = vpop.permute.xlu1 %940  ;;  %v2022_v31 = vpop.permute.xlu0 %935  ;;  %v1133_v3 = vadd.f32 %v1132_v61, %v1072_v53  ;;  %v703_v22 = vmul.f32 %v639_v49, %v639_v49  ;;  %v1076_v8 = vmul.f32 %v1932_v41, %v2010_v0  ;;  %v766_v52 = vsub.f32 0.0, %v702_v5 }
 0x104   : > { %v2064_v11 = vpop.eup %1478  ;;  %v1164_v35 = vadd.f32 %v1163_v14, %v1073_v54  ;;  %v1078_v44 = vmul.f32 %v1920_v24, %v2022_v31  ;;  %v1077_v37 = vmul.f32 %v1936_v48, %v2010_v0  ;;  %v1079_v53 = vmul.f32 %v1924_v27, %v2022_v31 }
 0x105   : > { %v2070_v6 = vpop.eup %1480  ;;  %v1134_v21 = vadd.f32 %v1133_v3, %v1074_v55  ;;  %1496 = vpow2.f32 %v874_v7  ;;  %v870_v49 = vmul.f32 1.442695, %v761_v18  ;;  %v700_v54 = vmul.f32 %v636_v36, %v636_v36 }
 0x106   : > { %v2074_v38 = vpop.eup %1482  ;;  %v1165_v10 = vadd.f32 %v1164_v35, %v1075_v47  ;;  %1498 = vpow2.f32 %v868_v28  ;;  %v701_v24 = vmul.f32 %v637_v42, %v637_v42  ;;  %v642_v5 = vsub.f32 %v1944_v58, %v1826_v12 }
 0x107   : > { %v2032_v60 = vpop.permute.xlu1 %950  ;;  %v2034_v40 = vpop.permute.xlu0 %945  ;;  %v1135_v41 = vadd.f32 %v1134_v21, %v1076_v8  ;;  %v767_v0 = vsub.f32 0.0, %v703_v22  ;;  %v1080_v27 = vmul.f32 %v1956_v19, %v2020_v9  ;;  %v880_v47 = vmul.f32 1.442695, %v766_v52 }
 0x108   : > { %v2082_v63 = vpop.eup %1484  ;;  %v1166_v55 = vadd.f32 %v1165_v10, %v1077_v37  ;;  %v1082_v18 = vmul.f32 %v1940_v51, %v2034_v40  ;;  %v1081_v36 = vmul.f32 %v1964_v26, %v2020_v9  ;;  %v1083_v42 = vmul.f32 %v1950_v2, %v2034_v40 }
 0x109   : > { %v2088_v15 = vpop.eup %1486  ;;  %v1136_v31 = vadd.f32 %v1135_v41, %v1078_v44  ;;  %1500 = vpow2.f32 %v870_v49  ;;  %v764_v35 = vsub.f32 0.0, %v700_v54  ;;  %v643_v22 = vsub.f32 %v1944_v58, %v1830_v13 }
 0x10a   : > { %v2094_v61 = vpop.eup %1488  ;;  %v1167_v28 = vadd.f32 %v1166_v55, %v1079_v53  ;;  %v765_v8 = vsub.f32 0.0, %v701_v24  ;;  %v706_v21 = vmul.f32 %v642_v5, %v642_v5  ;;  %v640_v51 = vsub.f32 %v1946_v59, %v1826_v12 }
 0x10b   : > { %v2054_v32 = vpop.permute.xlu1 %960  ;;  %v2056_v4 = vpop.permute.xlu0 %955  ;;  %v1137_v19 = vadd.f32 %v1136_v31, %v1080_v27  ;;  %v882_v26 = vmul.f32 1.442695, %v767_v0  ;;  %v1084_v2 = vmul.f32 %v1976_v45, %v2032_v60  ;;  %1502 = vpow2.f32 %v880_v47 }
 0x10c   : > { %v2096_v14 = vpop.eup %1490  ;;  %v1168_v44 = vadd.f32 %v1167_v28, %v1081_v36  ;;  %v1086_v40 = vmul.f32 %v1968_v30, %v2056_v4  ;;  %v1085_v10 = vmul.f32 %v1984_v34, %v2032_v60  ;;  %v1087_v49 = vmul.f32 %v1972_v23, %v2056_v4 }
 0x10d   : > { %v2108_v7 = vpop.eup %1492  ;;  %v1138_v9 = vadd.f32 %v1137_v19, %v1082_v18  ;;  %v876_v54 = vmul.f32 1.442695, %v764_v35  ;;  %v707_v41 = vmul.f32 %v643_v22, %v643_v22  ;;  %v641_v24 = vsub.f32 %v1946_v59, %v1830_v13 }
 0x10e   : > { %v2126_v58 = vpop.eup %1494  ;;  %v1169_v53 = vadd.f32 %v1168_v44, %v1083_v42  ;;  %v878_v5 = vmul.f32 1.442695, %v765_v8  ;;  %v770_v55 = vsub.f32 0.0, %v706_v21  ;;  %v704_v0 = vmul.f32 %v640_v51, %v640_v51 }
 0x10f   : > { %v2078_v29 = vpop.permute.xlu1 %970  ;;  %v2080_v57 = vpop.permute.xlu0 %965  ;;  %v1139_v45 = vadd.f32 %v1138_v9, %v1084_v2  ;;  %1504 = vpow2.f32 %v882_v26  ;;  %v1088_v23 = vmul.f32 %v1994_v17, %v2054_v32  ;;  %v646_v4 = vsub.f32 %v1960_v25, %v1826_v12 }
 0x110   : > { %v1170_v30 = vadd.f32 %v1169_v53, %v1085_v10  ;;  %v2138_v18 = vpop.eup %1496  ;;  %v1090_v60 = vmul.f32 %v1988_v1, %v2080_v57  ;;  %v1089_v47 = vmul.f32 %v2002_v39, %v2054_v32  ;;  %v1091_v28 = vmul.f32 %v1992_v46, %v2080_v57  ;;  %v2348_v53 = vld [vmem:[#allocation10_spill] sm:$0xff] }
 0x111   : > { %v1140_v34 = vadd.f32 %v1139_v45, %v1086_v40  ;;  %v2144_v59 = vpop.eup %1498  ;;  %1506 = vpow2.f32 %v876_v54  ;;  %v771_v42 = vsub.f32 0.0, %v707_v41  ;;  %v705_v35 = vmul.f32 %v641_v24, %v641_v24 }
 0x112   : > { %v1171_v36 = vadd.f32 %v1170_v30, %v1087_v49  ;;  %1508 = vpow2.f32 %v878_v5  ;;  %v888_v22 = vmul.f32 1.442695, %v770_v55  ;;  %v768_v19 = vsub.f32 0.0, %v704_v0 }
 0x113   : > { %v2100_v3 = vpop.permute.xlu1 %980  ;;  %v2102_v48 = vpop.permute.xlu0 %975  ;;  %v1141_v17 = vadd.f32 %v1140_v34, %v1088_v23  ;;  %v647_v39 = vsub.f32 %v1960_v25, %v1830_v13  ;;  %v1092_v46 = vmul.f32 %v2012_v16, %v2078_v29  ;;  %v710_v44 = vmul.f32 %v646_v4, %v646_v4 }
 0x114   : > { %v1172_v1 = vadd.f32 %v1171_v36, %v1089_v47  ;;  %v2156_v51 = vpop.eup %1500  ;;  %v1094_v57 = vmul.f32 %v2004_v43, %v2102_v48  ;;  %v1093_v26 = vmul.f32 %v2016_v20, %v2078_v29  ;;  %v1095_v9 = vmul.f32 %v2006_v50, %v2102_v48  ;;  %v2349_v48 = vld [vmem:[#allocation12_spill] sm:$0xff]  ;;  %v2350_v36 = vld [vmem:[#allocation11_spill] sm:$0xff] }
 0x115   : > { %v1142_v32 = vadd.f32 %v1141_v17, %v1090_v60  ;;  %v890_v40 = vmul.f32 1.442695, %v771_v42  ;;  %v769_v10 = vsub.f32 0.0, %v705_v35  ;;  %v644_v25 = vsub.f32 %v2348_v53, %v1826_v12  ;;  %v2170_v54 = vpop.eup %1502 }
 0x116   : > { %v1173_v2 = vadd.f32 %v1172_v1, %v1091_v28  ;;  %1510 = vpow2.f32 %v888_v22  ;;  %v884_v16 = vmul.f32 1.442695, %v768_v19  ;;  %v645_v43 = vsub.f32 %v2348_v53, %v1830_v13  ;;  %v2352_v22 = vld [vmem:[#allocation13_spill] sm:$0xff] }
 0x117   : > { %v2118_v52 = vpop.permute.xlu1 %990  ;;  %v2120_v37 = vpop.permute.xlu0 %985  ;;  %v1143_v49 = vadd.f32 %v1142_v32, %v1092_v46  ;;  %v711_v20 = vmul.f32 %v647_v39, %v647_v39  ;;  %v1096_v50 = vmul.f32 %v2030_v56, %v2100_v3  ;;  %v774_v5 = vsub.f32 0.0, %v710_v44  ;;  %v2353_v39 = vld [vmem:[#allocation16_spill] sm:$0xff] }
 0x118   : > { %v1174_v41 = vadd.f32 %v1173_v2, %v1093_v26  ;;  %v1098_v45 = vmul.f32 %v2349_v48, %v2120_v37  ;;  %v1097_v55 = vmul.f32 %v2036_v62, %v2100_v3  ;;  %v1099_v30 = vmul.f32 %v2026_v33, %v2120_v37  ;;  %v2351_v3 = vld [vmem:[#allocation15_spill] sm:$0xff] }
 0x119   : > { %v1144_v29 = vadd.f32 %v1143_v49, %v1094_v57  ;;  %v2184_v34 = vpop.eup %1504  ;;  %1512 = vpow2.f32 %v890_v40  ;;  %v886_v60 = vmul.f32 1.442695, %v769_v10  ;;  %v708_v4 = vmul.f32 %v644_v25, %v644_v25  ;;  %v2354_v57 = vld [vmem:[#allocation14_spill] sm:$0xff] }
 0x11a   : > { %v1175_v0 = vadd.f32 %v1174_v41, %v1095_v9  ;;  %1514 = vpow2.f32 %v884_v16  ;;  %v709_v56 = vmul.f32 %v645_v43, %v645_v43  ;;  %v648_v28 = vsub.f32 %v2350_v36, %v1826_v12 }
 0x11b   : > { %v2134_v27 = vpop.permute.xlu1 %1000  ;;  %v2136_v31 = vpop.permute.xlu0 %995  ;;  %v1145_v47 = vadd.f32 %v1144_v29, %v1096_v50  ;;  %v649_v33 = vsub.f32 %v2350_v36, %v1830_v13  ;;  %v1100_v37 = vmul.f32 %v2351_v3, %v2118_v52  ;;  %v1101_v46 = vmul.f32 %v2353_v39, %v2118_v52 }
 0x11c   : > { %v1176_v42 = vadd.f32 %v1175_v0, %v1097_v55  ;;  %v2188_v62 = vpop.eup %1506  ;;  %v1102_v19 = vmul.f32 %v2352_v22, %v2136_v31  ;;  %v1103_v44 = vmul.f32 %v2354_v57, %v2136_v31  ;;  %v775_v2 = vsub.f32 0.0, %v711_v20 }
 0x11d   : > { %v1146_v17 = vadd.f32 %v1145_v47, %v1098_v45  ;;  %v2196_v1 = vpop.eup %1508  ;;  %v896_v9 = vmul.f32 1.442695, %v774_v5  ;;  %v772_v53 = vsub.f32 0.0, %v708_v4  ;;  %v773_v25 = vsub.f32 0.0, %v709_v56 }
 0x11e   : > { %v1177_v32 = vadd.f32 %v1176_v42, %v1099_v30  ;;  %v712_v49 = vmul.f32 %v648_v28, %v648_v28  ;;  %v713_v52 = vmul.f32 %v649_v33, %v649_v33  ;;  %1516 = vpow2.f32 %v886_v60 }
 0x11f   : > { %v2152_v8 = vpop.permute.xlu1 %1010  ;;  %v2154_v21 = vpop.permute.xlu0 %1005  ;;  %v1147_v40 = vadd.f32 %v1146_v17, %v1100_v37  ;;  %v898_v5 = vmul.f32 1.442695, %v775_v2  ;;  %v894_v30 = vmul.f32 1.442695, %v773_v25  ;;  %1518 = vpow2.f32 %v896_v9 }
 0x120   : > { %v1178_v16 = vadd.f32 %v1177_v32, %v1101_v46  ;;  %v1106_v41 = vmul.f32 %v2064_v11, %v2154_v21  ;;  %v2217_v20 = vpop.eup %1510  ;;  %v1107_v29 = vmul.f32 %v2070_v6, %v2154_v21  ;;  %v777_v47 = vsub.f32 0.0, %v713_v52 }
 0x121   : > { %v1148_v31 = vadd.f32 %v1147_v40, %v1102_v19  ;;  %v1109_v60 = vmul.f32 %v2108_v7, %v2152_v8 }
 0x122   : > { %v1179_v50 = vadd.f32 %v1178_v16, %v1103_v44 }
 0x123   : > { %v2174_v24 = vpop.permute.xlu0 %1015  ;;  %v575_v23 = vpop.permute.xlu1 %574 }
 0x124   : > { %v650_v26 = vsub.f32 %v575_v23, %v1826_v12  ;;  %v651_v10 = vsub.f32 %v575_v23, %v1830_v13  ;;  %v1104_v12 = vmul.f32 %v2074_v38, %v2134_v27  ;;  %v1105_v13 = vmul.f32 %v2082_v63, %v2134_v27  ;;  %v2223_v4 = vpop.eup %1512 }
 0x125   : > { %v892_v38 = vmul.f32 1.442695, %v772_v53  ;;  %v776_v23 = vsub.f32 0.0, %v712_v49  ;;  %v1108_v63 = vmul.f32 %v2096_v14, %v2152_v8  ;;  %v1110_v6 = vmul.f32 %v2088_v15, %v2174_v24  ;;  %v1515_v21 = vpop.eup %1514 }
 0x126   : > { %v714_v48 = vmul.f32 %v650_v26, %v650_v26  ;;  %v1149_v55 = vadd.f32 %v1148_v31, %v1104_v12  ;;  %v715_v0 = vmul.f32 %v651_v10, %v651_v10  ;;  %v1180_v11 = vadd.f32 %v1179_v50, %v1105_v13 }
 0x127   : > { %v1021_v35 = vpop.permute.xlu0 %1020  ;;  %v1026_v43 = vpop.permute.xlu1 %1025  ;;  %v1111_v28 = vmul.f32 %v2094_v61, %v2174_v24  ;;  %1520 = vpow2.f32 %v892_v38  ;;  %v900_v15 = vmul.f32 1.442695, %v776_v23  ;;  %v902_v8 = vmul.f32 1.442695, %v777_v47 }
 0x128   : > { %v1150_v27 = vadd.f32 %v1149_v55, %v1106_v41  ;;  %v1181_v56 = vadd.f32 %v1180_v11, %v1107_v29  ;;  %v778_v36 = vsub.f32 0.0, %v714_v48  ;;  %v779_v14 = vsub.f32 0.0, %v715_v0  ;;  %v1517_v44 = vpop.eup %1516  ;;  %v416_v29 = vld [vmem:[%s334_s28] sm:$0x3] }
 0x129   : > { %v1112_v3 = vmul.f32 %v2144_v59, %v1021_v35  ;;  %v1113_v17 = vmul.f32 %v2156_v51, %v1021_v35  ;;  %1522 = vpow2.f32 %v894_v30  ;;  %v1114_v51 = vmul.f32 %v2126_v58, %v1026_v43  ;;  %v1519_v53 = vpop.eup %1518 }
 0x12a   : > { %v1151_v33 = vadd.f32 %v1150_v27, %v1108_v63  ;;  %v1182_v37 = vadd.f32 %v1181_v56, %v1109_v60  ;;  %1524 = vpow2.f32 %v898_v5  ;;  %v904_v59 = vmul.f32 1.442695, %v778_v36 }
 0x12b   : > { %v1031_v45 = vpop.permute.xlu0 %1030  ;;  %v1036_v42 = vpop.permute.xlu1 %1035  ;;  %v906_v22 = vmul.f32 1.442695, %v779_v14  ;;  %1526 = vpow2.f32 %v900_v15  ;;  %v1115_v39 = vmul.f32 %v2138_v18, %v1026_v43  ;;  %v1196_v48 = vstv %s2375_s25 }
 0x12c   : > { %v1152_v61 = vadd.f32 %v1151_v33, %v1110_v6  ;;  %v1183_v24 = vadd.f32 %v1182_v37, %v1111_v28  ;;  %v1116_v19 = vmul.f32 %v2188_v62, %v1031_v45  ;;  %v1117_v32 = vmul.f32 %v2196_v1, %v1031_v45  ;;  %v2356_v28 = vld [vmem:[#allocation9_spill] sm:$0xff] }
 0x12d   : > { %1528 = vpow2.f32 %v902_v8  ;;  %v1118_v2 = vmul.f32 %v2170_v54, %v1036_v42  ;;  %v1119_v1 = vmul.f32 %v2184_v34, %v1036_v42  ;;  %v1197_v11 = vmul.f32 %v1196_v48, %v416_v29 }
 0x12e   : > { %v1153_v35 = vadd.f32 %v1152_v61, %v1112_v3  ;;  %v1184_v46 = vadd.f32 %v1183_v24, %v1113_v17  ;;  %1530 = vpow2.f32 %v904_v59  ;;  %v2357_v42 = vsub.s32 0, %v2356_v28 }
 0x12f   : > { %v1041_v7 = vpop.permute.xlu0 %1040  ;;  %v1046_v57 = vpop.permute.xlu1 %1045  ;;  %1532 = vpow2.f32 %v906_v22  ;;  %v2358_v15 = vsub.s32 1, %v2356_v28 }
 0x130   : > { %v1154_v26 = vadd.f32 %v1153_v35, %v1114_v51  ;;  %v1185_v58 = vadd.f32 %v1184_v46, %v1115_v39  ;;  %v1120_v9 = vmul.f32 %v1515_v21, %v1041_v7  ;;  %v1121_v10 = vmul.f32 %v1517_v44, %v1041_v7 }
 0x131   : > { %v1521_v49 = vpop.eup %1520  ;;  %v1122_v54 = vmul.f32 %v2217_v20, %v1046_v57  ;;  %v1123_v41 = vmul.f32 %v2223_v4, %v1046_v57  ;;  %v1202_v14 = vrot.slane %v1197_v11, %v2357_v42  ;;  %v1206_v37 = vrot.slane %v1197_v11, %v2358_v15 }
 0x132   : > { %v1155_v18 = vadd.f32 %v1154_v26, %v1116_v19  ;;  %v1186_v40 = vadd.f32 %v1185_v58, %v1117_v32 }
 0x133   : > { %v1051_v62 = vpop.permute.xlu0 %1050  ;;  %v1056_v43 = vpop.permute.xlu1 %1055 }
 0x134   : > { %v1156_v25 = vadd.f32 %v1155_v18, %v1118_v2  ;;  %v1187_v16 = vadd.f32 %v1186_v40, %v1119_v1  ;;  %v1523_v52 = vpop.eup %1522  ;;  %v1124_v31 = vmul.f32 %v1521_v49, %v1051_v62  ;;  %v1126_v30 = vmul.f32 %v1519_v53, %v1056_v43 }
 0x135   : > { %v1525_v34 = vpop.eup %1524  ;;  %v1125_v50 = vmul.f32 %v1523_v52, %v1051_v62 }
 0x136   : > { %v1157_v12 = vadd.f32 %v1156_v25, %v1120_v9  ;;  %v1188_v13 = vadd.f32 %v1187_v16, %v1121_v10  ;;  %v1527_v55 = vpop.eup %1526  ;;  %v1127_v63 = vmul.f32 %v1525_v34, %v1056_v43 }
 0x137   : > { %v1061_v45 = vpop.permute.xlu0 %1060  ;;  %v1529_v38 = vpop.eup %1528 }
 0x138   : > { %v1158_v5 = vadd.f32 %v1157_v12, %v1122_v54  ;;  %v1189_v0 = vadd.f32 %v1188_v13, %v1123_v41  ;;  %v1128_v20 = vmul.f32 %v1527_v55, %v1061_v45  ;;  %v1531_v47 = vpop.eup %1530  ;;  %v1066_v4 = vpop.permute.xlu1 %1065  ;;  %v1129_v6 = vmul.f32 %v1529_v38, %v1061_v45 }
 0x139   : > { %v1533_v21 = vpop.eup %1532  ;;  %v1130_v36 = vmul.f32 %v1531_v47, %v1066_v4 }
 0x13a   : > { %v1159_v23 = vadd.f32 %v1158_v5, %v1124_v31  ;;  %v1190_v27 = vadd.f32 %v1189_v0, %v1125_v50  ;;  %v1131_v3 = vmul.f32 %v1533_v21, %v1066_v4 }
 0x13c   : > { %v1160_v60 = vadd.f32 %v1159_v23, %v1126_v30  ;;  %v1191_v56 = vadd.f32 %v1190_v27, %v1127_v63 }
 0x13e   : > { %v1161_v33 = vadd.f32 %v1160_v60, %v1128_v20  ;;  %v1192_v17 = vadd.f32 %v1191_v56, %v1129_v6 }
 0x140   : > { %v1162_v7 = vadd.f32 %v1161_v33, %v1130_v36  ;;  %v1193_v8 = vadd.f32 %v1192_v17, %v1131_v3 }
 0x142   : > { %v1209_v61 = vmul.f32 %v1202_v14, %v1162_v7  ;;  %v1210_v59 = vmul.f32 %v1206_v37, %v1193_v8 }
 0x144   : > { %1213 = vst [vmem:[%s299_s12] sm:$0xff] %v1209_v61  ;;  %1214 = vst [vmem:[%s299_s12 + $0x8] sm:$0xff] %v1210_v59 }
 0x145   : > { %1571 = shalt.err (!%p1568_p7)
}
 0x146   : > { %s1572_s25 = scalar_lea.hbm %s2276_s20, 256  ;;  %s1576_s28 = scalar_lea.hbm %s2330_s6, 512 }
 0x147   : > { %p1573_p8 = scmp.ne.s32.totalorder %s2276_s20, %s1572_s25  ;;  %p1577_p11 = scmp.lt.u32.totalorder %s2276_s20, %s2330_s6 }
 0x148   : > { %p1578_p12 = scmp.lt.u32.totalorder %s1576_s28, %s1572_s25  ;;  %p1580_p1 = scmp.lt.u32.totalorder %s1572_s25, %s2276_s20 }
 0x149   : > { %p1574_p9 = pnand %p1573_p8, %p1725_p0 }
 0x14a   : > { %p1579_p13 = por %p1578_p12, %p1577_p11 }
 0x14b   : > { %p1575_p10 = pneg %p1574_p9 }
 0x14c   : > { %p1581_p2 = por %p1580_p1, %p1579_p13 }
 0x14e   : > { %p1582_p3 = pnand %p1581_p2, %p1575_p10 }
 0x150   : > { %1585 = shalt.err (!%p1582_p3)
}
 0x151   : > { %1345 = dma.vmem_to_hbm [thread:$0]  (%p1725_p0), %s2278_s14, 256, %s2276_s20, %s1216_s21  }
 0x152 PF: > { %p1351_p5 = scmp.ge.s32.totalorder %s1638_s10, 2  ;;  %s1242_s11 = sand.u32 1, %s1618_s1  }
 0x153   : > { %s1243_s12 = scalar_lea.sflag [#allocation6], %s1242_s11 }
 0x154   : > { %p1348_p6 = pnand %p1351_p5, %p1732_p4 }
 0x156   : > { %1613 = dma.done.wait (!%p1348_p6), %s1243_s12, 256  }
 0x157   : > { %1615 = vsyncadd (!%p1348_p6), %s1243_s12, 4294967040  ;;  %s29_s10 = sadd.s32 1, %s1638_s10   ;;  %s2359_s1 = smov %s1622_s30 }
 0x158   : > { %p26_p7 = scmp.ge.s32.totalorder %s29_s10, 4   ;;  %s2360_s30 = smov %s1626_s7 }
 0x159   : > { %s2361_s7 = smov %s1738_s18  ;;  %s2362_s8 = smov %s1634_s9 }
 0x15a   : > { %s2363_s9 = smov %s2365_s13  ;;  %28 = sbr.rel (!%p26_p7) target bundleno = 29 (0x1d), region = 84 }
 0x161   :  { %1248 = vsyncpa [#allocation6], 1 }
 0x162   :  { %1250 = vsyncpa [#allocation6 + $0x1], 1 }

</bundles_post_ra>
